<compile_context>
chip_gen: v5e
topology: v5e:2x2
jax: 0.10.0
libtpu: 0.0.40
codegen_flags: <defaults>
</compile_context>

<pallas_src>
import jax
import jax.numpy as jnp
from jax.experimental import pallas as pl
from jax.experimental.pallas import tpu as pltpu


def _round_up(v, m):
    return ((v + m - 1) // m) * m


# --------------- fast path: weight-stationary, single K tile ----------------
def _linear_kernel_single(x_ref, wt_ref, b_ref, o_ref):
    # x_ref: (tm, D), wt_ref: (D, O) resident, b_ref: (1, O) resident, o_ref: (tm, O)
    o_ref[...] = (
        jnp.dot(x_ref[...], wt_ref[...], preferred_element_type=jnp.float32)
        + b_ref[...]
    ).astype(o_ref.dtype)


# --------------- fallback: tiled GEMM, accumulate into o_ref ----------------
def _linear_kernel_tiled(x_ref, wt_ref, b_ref, o_ref):
    k = pl.program_id(2)

    @pl.when(k == 0)
    def _():
        # Fold the bias add into accumulator init (no separate finalize pass).
        o_ref[...] = jnp.broadcast_to(b_ref[...], o_ref.shape).astype(o_ref.dtype)

    o_ref[...] += jnp.dot(
        x_ref[...], wt_ref[...], preferred_element_type=jnp.float32
    )


def prepare_linear_params(weight, bias, *, use_bf16=False):
    """Once-per-model param transform (hoisted out of the forward call).

    weight: (O, D) PyTorch nn.Linear layout  ->  returns Wt (D, O), bias (1, O).
    """
    op_dtype = jnp.bfloat16 if use_bf16 else jnp.float32
    w_t = jnp.asarray(weight, jnp.float32).T.astype(op_dtype)   # (D, O)
    b2d = jnp.asarray(bias, jnp.float32).reshape(1, -1)          # (1, O), f32
    return w_t, b2d


def logistic_regression_forward(x, w_t, b2d, *, tm=256, tn=256, tk=512):
    """Forward pass of Logistic_Regression (a plain nn.Linear).

    x:   (B, D) any float/int dtype -> cast to f32 (matches x.float()), then to
         the operand dtype of w_t (bf16 only if prepare_linear_params used it).
    w_t: (D, O) pre-transposed weight.
    b2d: (1, O) f32 bias.
    returns (B, O) f32.
    """
    op_dtype = w_t.dtype
    x = x.astype(jnp.float32).astype(op_dtype)
    B, D = x.shape
    O = w_t.shape[1]
    elt = jnp.dtype(op_dtype).itemsize

    # Weight-stationary path when the whole weight (plus one x / out batch tile)
    # comfortably fits VMEM on every generation (incl. v7x's 64 MiB).
    single_tile_ok = (D * O * elt <= 8 * 1024 * 1024) and D <= 4096 and O <= 2048

    if single_tile_ok:
        if B <= tm:
            tm_eff, Bp = B, B            # full-dim batch block: no padding at all
        else:
            tm_eff = tm                  # multiple of 8 (sublane aligned)
            Bp = _round_up(B, tm_eff)
        xb = x if Bp == B else jnp.pad(x, ((0, Bp - B), (0, 0)))
        grid = (Bp // tm_eff,)

        cost = pl.CostEstimate(
            flops=2 * Bp * D * O,
            transcendentals=0,
            bytes_accessed=(Bp * D + D * O) * elt + (Bp * O + O) * 4,
        )

        out = pl.pallas_call(
            _linear_kernel_single,
            out_shape=jax.ShapeDtypeStruct((Bp, O), jnp.float32),
            grid_spec=pltpu.PrefetchScalarGridSpec(
                num_scalar_prefetch=0,
                grid=grid,
                in_specs=[
                    pl.BlockSpec((tm_eff, D), lambda i: (i, 0)),  # x: batch-sliced
                    pl.BlockSpec((D, O), lambda i: (0, 0)),       # Wt: DMA'd once, resident
                    pl.BlockSpec((1, O), lambda i: (0, 0)),       # bias: resident
                ],
                out_specs=pl.BlockSpec((tm_eff, O), lambda i: (i, 0)),
            ),
            compiler_params=pltpu.CompilerParams(
                dimension_semantics=("parallel",),   # megacore-shards batch on v7x when grid>1
                vmem_limit_bytes=32 * 1024 * 1024,
            ),
            cost_estimate=cost,
        )(xb, w_t, b2d)
        return out if Bp == B else out[:B]

    # ---------------- tiled fallback for large D / O ----------------
    tm = min(tm, _round_up(B, 8))
    tn = min(tn, _round_up(O, 128))
    tk = min(tk, _round_up(D, 128))
    Bp, Dp, Op = _round_up(B, tm), _round_up(D, tk), _round_up(O, tn)
    if (Bp, Dp) != (B, D):
        x = jnp.pad(x, ((0, Bp - B), (0, Dp - D)))
    if (Dp, Op) != (D, O):
        w_t = jnp.pad(w_t, ((0, Dp - D), (0, Op - O)))
    if Op != O:
        b2d = jnp.pad(b2d, ((0, 0), (0, Op - O)))

    grid = (Bp // tm, Op // tn, Dp // tk)
    cost = pl.CostEstimate(
        flops=2 * Bp * Dp * Op,
        transcendentals=0,
        # W tiles are re-fetched once per batch tile under this grid order.
        bytes_accessed=(Bp * Dp + Dp * Op * (Bp // tm)) * elt + (Bp * Op + Op) * 4,
    )

    out = pl.pallas_call(
        _linear_kernel_tiled,
        out_shape=jax.ShapeDtypeStruct((Bp, Op), jnp.float32),
        grid_spec=pltpu.PrefetchScalarGridSpec(
            num_scalar_prefetch=0,
            grid=grid,
            in_specs=[
                pl.BlockSpec((tm, tk), lambda i, j, k: (i, k)),   # x tile
                pl.BlockSpec((tk, tn), lambda i, j, k: (k, j)),   # Wt tile
                pl.BlockSpec((1, tn), lambda i, j, k: (0, j)),    # bias tile
            ],
            out_specs=pl.BlockSpec((tm, tn), lambda i, j, k: (i, j)),  # resident across k
        ),
        compiler_params=pltpu.CompilerParams(
            dimension_semantics=("parallel", "parallel", "arbitrary"),
            vmem_limit_bytes=32 * 1024 * 1024,
        ),
        cost_estimate=cost,
    )(x, w_t, b2d)
    return out[:B, :O]


if __name__ == "__main__":
    # Small shapes consistent with the module: input_dim=32, output_dim=8, batch=4
    input_dim, output_dim, batch = 32, 8, 4

    key = jax.random.PRNGKey(0)
    kx, kw, kb = jax.random.split(key, 3)

    # Deterministic params mimicking nn.Linear's uniform(-1/sqrt(D), 1/sqrt(D)) init.
    bound = 1.0 / (input_dim ** 0.5)
    weight = jax.random.uniform(kw, (output_dim, input_dim),
                                minval=-bound, maxval=bound, dtype=jnp.float32)
    bias = jax.random.uniform(kb, (output_dim,),
                              minval=-bound, maxval=bound, dtype=jnp.float32)
    x = jax.random.normal(kx, (batch, input_dim), dtype=jnp.float32)

    # Param transform hoisted out of the forward path (done once per model).
    w_t, b2d = prepare_linear_params(weight, bias, use_bf16=False)

    fwd = jax.jit(logistic_regression_forward)
    out = jax.block_until_ready(fwd(x, w_t, b2d))

    # Verify against plain-JAX reference
    ref = x @ weight.T + bias
    assert out.shape == (batch, output_dim)
    assert jnp.allclose(out, ref, atol=1e-5, rtol=1e-5)

    print("KERNEL_OK")
</pallas_src>

<mosaic_0001>
module attributes {stable_mosaic.version = 11 : i64} {
  func.func @_linear_kernel_single(%arg0: i32, %arg1: memref<4x32xf32, #tpu.memory_space<vmem>>, %arg2: memref<32x8xf32, #tpu.memory_space<vmem>>, %arg3: memref<1x8xf32, #tpu.memory_space<vmem>>, %arg4: memref<4x8xf32, #tpu.memory_space<vmem>>) attributes {dimension_semantics = [#tpu.dimension_semantics<parallel>], iteration_bounds = array<i64: 1>, scalar_prefetch = 0 : i64, scratch_operands = 0 : i64, tpu.core_type = #tpu.core_type<tc>, window_params = [{transform_indices = @transform_0, window_bounds = array<i64: 4, 32>}, {pipeline_mode = #tpu.pipeline_mode<synchronous>, transform_indices = @transform_1, window_bounds = array<i64: 32, 8>}, {pipeline_mode = #tpu.pipeline_mode<synchronous>, transform_indices = @transform_2, window_bounds = array<i64: 1, 8>}, {transform_indices = @transform_3, window_bounds = array<i64: 4, 8>}]} {
    %c0 = arith.constant 0 : index
    %c0_0 = arith.constant 0 : index
    %0 = vector.load %arg1[%c0, %c0_0] : memref<4x32xf32, #tpu.memory_space<vmem>>, vector<4x32xf32>
    %c0_1 = arith.constant 0 : index
    %c0_2 = arith.constant 0 : index
    %1 = vector.load %arg2[%c0_1, %c0_2] : memref<32x8xf32, #tpu.memory_space<vmem>>, vector<32x8xf32>
    %cst = arith.constant dense<0.000000e+00> : vector<4x8xf32>
    %2 = tpu.matmul %0, %1, %cst {dimension_numbers = #tpu.dot_dimension_numbers<[1], [0], [0], [1], [0, 0, 1, 1], [], []>} : vector<4x32xf32>, vector<32x8xf32>, vector<4x8xf32> -> vector<4x8xf32>
    %c0_3 = arith.constant 0 : index
    %c0_4 = arith.constant 0 : index
    %3 = vector.load %arg3[%c0_3, %c0_4] : memref<1x8xf32, #tpu.memory_space<vmem>>, vector<1x8xf32>
    %4 = vector.broadcast %3 : vector<1x8xf32> to vector<4x8xf32>
    %5 = arith.addf %2, %4 : vector<4x8xf32>
    %c0_5 = arith.constant 0 : index
    %c0_6 = arith.constant 0 : index
    %6 = vector.load %arg4[%c0_5, %c0_6] : memref<4x8xf32, #tpu.memory_space<vmem>>, vector<4x8xf32>
    tpu.vector_store %arg4[%c0_5, %c0_6], %5 {strides = array<i32>} : memref<4x8xf32, #tpu.memory_space<vmem>>, vector<4x8xf32>,
    return
  }
  func.func @transform_0(%arg0: i32) -> (i32, i32) {
    %c0_i32 = arith.constant 0 : i32
    %c0_i32_0 = arith.constant 0 : i32
    return %arg0, %c0_i32 : i32, i32
  }
  func.func @transform_1(%arg0: i32) -> (i32, i32) {
    %c0_i32 = arith.constant 0 : i32
    %c0_i32_0 = arith.constant 0 : i32
    %c0_i32_1 = arith.constant 0 : i32
    return %c0_i32, %c0_i32_0 : i32, i32
  }
  func.func @transform_2(%arg0: i32) -> (i32, i32) {
    %c0_i32 = arith.constant 0 : i32
    %c0_i32_0 = arith.constant 0 : i32
    %c0_i32_1 = arith.constant 0 : i32
    return %c0_i32, %c0_i32_0 : i32, i32
  }
  func.func @transform_3(%arg0: i32) -> (i32, i32) {
    %c0_i32 = arith.constant 0 : i32
    %c0_i32_0 = arith.constant 0 : i32
    return %arg0, %c0_i32 : i32, i32
  }
}

</mosaic_0001>

<bundles_post_ra>
// kernel: logistic_regression_forward.1
= control target key start
LH: loop header
LB: loop body
LE: loop exit
PB: predicated region body
PF: predicated region fallthrough
CT: control target
= control target key end

     0   :  { %s137_s0 = inlined_call_operand.vmem [shape: f32[4,32], index: 0, kind: input, shape index: {}]   ;;  %s138_s1 = inlined_call_operand.vmem [shape: f32[32,8], index: 1, kind: input, shape index: {}]   ;;  %s139_s2 = inlined_call_operand.vmem [shape: f32[1,8], index: 2, kind: input, shape index: {}]   ;;  %s140_s3 = inlined_call_operand.hbm [shape: f32[4,8], index: 3, kind: output, shape index: {}]  }
   0x1   :  { %v19_v0 = vld [vmem:[%s138_s1 + $0x18] sm:$0xff]  ;;  %v18_v1 = vld [vmem:[%s138_s1 + $0x10] sm:$0xff]  ;;  %v17_v2 = vld [vmem:[%s138_s1 + $0x8] sm:$0xff] }
   0x2   :  { %40 = vmatpush.msra.mxu0 %v19_v0 }
   0x3   :  { %8 = vsyncpa [#allocation3], 0  ;;  %v16_v3 = vld [vmem:[%s138_s1] sm:$0xff]  ;;  %vm24_vm0 = vcmask 261120   ;;  %s95_s24 = smov [#allocation2]   ;;  %s57_s28 = sshll.u32 %s140_s3, 4  ;;  %s58_s28 = int_to_ptr.hbm [resolvable:$true] %s57_s28 }
   0x4   :  { %41 = vmatpush.msra.mxu0 %v18_v1  ;;  %v15_v4 = vld [vmem:[%s137_s0] sm:$0xf]  ;;  %s55_s25 = sshll.u32 %s95_s24, 4  ;;  %vm48_vm1 = vcmask 60416   ;;  %s56_s25 = int_to_ptr.vmem [resolvable:$true] %s55_s25 }
   0x5   :  { %v68_v5 = vld [vmem:[%s139_s2] ss:$0 sm:$0xff] }
   0x6   :  { %42 = vmatpush.msra.mxu0 %v17_v2 }
   0x8   :  { %43 = vmatpush.msra.mxu0 %v16_v3 }
   0x9   :  { %66 = vmatmul.msk.f32.vlgmr.msra.gmra.mxu0 %vm24_vm0, %v15_v4 }
  0x86   :  { %v45_v6 = vpop.f32.mrf.mxu0 }
  0x87   :  { %v46_v7 = vadd.f32 %v68_v5, %v45_v6 }
  0x89   :  { %49 = vst.msk [vmem:[#allocation2] sm:$0xf] %vm48_vm1, %v46_v7 }
  0x8a   :  { %60 = dma.vmem_to_hbm [thread:$0]  %s56_s25, 64, %s58_s28, [#allocation3]  }
  0x8b   :  { %93 = dma.done.wait [#allocation3], 64  }
  0x8c   :  { %94 = vsyncadd [#allocation3], 4294967232 }
  0x8d   :  { %65 = vsyncpa [#allocation3], 1 }

</bundles_post_ra>
